<compile_context>
chip_gen: v6e
topology: v6e:2x2x1
jax: 0.10.0
libtpu: 0.0.40
codegen_flags: <defaults>
</compile_context>

<pallas_src>
import jax
import jax.numpy as jnp
from jax import lax
from jax.experimental import pallas as pl
from jax.experimental.pallas import tpu as pltpu


# ----------------------------- kernel body ---------------------------------
def _sa_kernel(xc_ref, xt_ref, xb_ref, w1_ref, b1_ref, w2_ref, b2_ref, o_ref):
    # xc_ref: (1, TH, WC)  center rows (also the residual), lane-merged (w, c)
    # xt_ref: (1, 8, WC)   8-row block whose LAST row is the row above the tile
    # xb_ref: (1, 8, WC)   8-row block whose FIRST row is the row below the tile
    # w1_ref: (3, WC, WC)  banded 3x3 weights, one block-tridiagonal matrix per ky
    # b1_ref: (1, WC)
    # w2_ref: (WC, WC)     block-diagonal 1x1 weights
    # b2_ref: (1, WC)
    # o_ref : (1, TH, WC)
    _, TH, WC = xc_ref.shape
    f32 = jnp.float32
    h = pl.program_id(1)
    n_h = pl.num_programs(1)

    x_c = xc_ref[0]                                                   # (TH, WC) f32
    top = jnp.where(h > 0, xt_ref[0][7:8, :], 0.0).astype(f32)        # row h0 - 1
    bot = jnp.where(h < n_h - 1, xb_ref[0][0:1, :], 0.0).astype(f32)  # row h0 + TH

    # Row-shifted views of the tile (the ky = 0 / ky = 2 taps of the 3x3 conv).
    # TODO(synk): pltpu.roll(axis=0) + iota select would push this to the idle XLU.
    x_up = jnp.concatenate([top, x_c[: TH - 1]], axis=0)              # rows h - 1
    x_dn = jnp.concatenate([x_c[1:], bot], axis=0)                    # rows h + 1

    mm = w1_ref.dtype
    acc = jnp.dot(x_up.astype(mm), w1_ref[0], preferred_element_type=f32)
    acc += jnp.dot(x_c.astype(mm), w1_ref[1], preferred_element_type=f32)
    acc += jnp.dot(x_dn.astype(mm), w1_ref[2], preferred_element_type=f32)
    conv1 = jnp.maximum(acc + b1_ref[...], 0.0)                       # (TH, WC) f32

    att = jax.nn.sigmoid(
        jnp.dot(conv1.astype(mm), w2_ref[...], preferred_element_type=f32)
        + b2_ref[...])                                                # (TH, WC) f32

    o_ref[0] = (x_c + att * conv1).astype(o_ref.dtype)


# ----------------------------- tiling choice --------------------------------
def _round_up(x, m):
    return -(-x // m) * m


def _per_step_vmem_bytes(th, wc, weight_bytes):
    """Lane-padded, double-buffered per-grid-step VMEM estimate (bytes)."""
    blk = _round_up(th, 8) * _round_up(wc, 128) * 4        # one f32 (TH, WC) tile
    halo = 8 * _round_up(wc, 128) * 4                      # one 8-row halo block
    # center in + out (2 pipeline buffers each), 2 halo streams (2 buffers each),
    # ~6 live f32 temporaries, weights (constant-index specs still get 2 buffers).
    return 4 * blk + 4 * halo + 6 * blk + 2 * weight_bytes


def _choose_tile_h(n, h_total, wc, weight_bytes, budget_bytes=24 * 1024 * 1024):
    cands = [d for d in range(8, h_total + 1, 8) if h_total % d == 0]
    fits = [d for d in cands
            if _per_step_vmem_bytes(d, wc, weight_bytes) <= budget_bytes]
    if not fits:
        fits = cands[:1]
    th = max(fits)
    # Keep >= 2 grid steps overall (v7x has 2 TensorCores per chip).
    if n * (h_total // th) < 2:
        multi = [d for d in fits if h_total // d >= 2]
        if multi:
            th = max(multi)
    return th


# ----------------------------- wrappers --------------------------------------
def sa_block_nhwc(x_nhwc, w1, b1, w2, b2, *, tile_h=None,
                  matmul_dtype=jnp.bfloat16):
    """x_nhwc: (N, H, W, C) f32.  w1: (3, 3, C, C) HWIO.  w2: (C, C) (in, out)."""
    N, H, W, C = x_nhwc.shape
    WC = W * C
    assert H % 8 == 0, "H must be a multiple of 8"   # TODO(synk): ragged-H support
    assert WC <= 4096, "banded path targets small/medium W*C"

    # ---- lane-merged activation view: minor dim = W*C (lane-dense for C << 128)
    x = x_nhwc.reshape(N, H, WC)

    # ---- banded weights, built once outside the kernel ----
    # B_ky[w_in*C + ci, w_out*C + co] = w1[ky, kx, ci, co]  with  kx = w_in - w_out + 1
    w1f = w1.astype(jnp.float32)
    bands = []
    for ky in range(3):
        b_ky = sum(jnp.kron(jnp.eye(W, k=-(kx - 1), dtype=jnp.float32), w1f[ky, kx])
                   for kx in range(3))
        bands.append(b_ky)
    w1_band = jnp.stack(bands, axis=0).astype(matmul_dtype)           # (3, WC, WC)
    w2_blk = jnp.kron(jnp.eye(W, dtype=jnp.float32),
                      w2.astype(jnp.float32)).astype(matmul_dtype)    # (WC, WC)
    b1_m = jnp.tile(b1.astype(jnp.float32), W).reshape(1, WC)
    b2_m = jnp.tile(b2.astype(jnp.float32), W).reshape(1, WC)

    w_isz = jnp.dtype(matmul_dtype).itemsize
    weight_bytes = (4 * _round_up(WC, 8) * _round_up(WC, 128) * w_isz
                    + 2 * 8 * _round_up(WC, 128) * 4)

    TH = _choose_tile_h(N, H, WC, weight_bytes) if tile_h is None else tile_h
    assert H % TH == 0 and TH % 8 == 0, \
        "tile_h must divide H and be a multiple of 8"

    n_h = H // TH
    thb = TH // 8                 # tile height in 8-row halo blocks
    hb_last = H // 8 - 1          # last valid 8-row block index along H

    def center_map(n, h):
        return (n, h, 0)

    def top_map(n, h):            # block whose LAST row is the row above the tile
        return (n, jnp.maximum(h * thb - 1, 0), 0)

    def bot_map(n, h):            # block whose FIRST row is the row below the tile
        return (n, jnp.minimum((h + 1) * thb, hb_last), 0)

    def wmap3(n, h):
        return (0, 0, 0)

    def wmap2(n, h):
        return (0, 0)

    est = _per_step_vmem_bytes(TH, WC, weight_bytes)
    vmem_limit = int(min(48 * 1024 * 1024, max(32 * 1024 * 1024, 2 * est)))

    cost = pl.CostEstimate(
        flops=int(8 * N * H * WC * WC),          # 3 band matmuls + 1 block-diag matmul
        transcendentals=int(N * H * WC),         # sigmoid
        bytes_accessed=int(2 * N * H * WC * 4 + 4 * WC * WC * w_isz),
    )

    y = pl.pallas_call(
        _sa_kernel,
        out_shape=jax.ShapeDtypeStruct((N, H, WC), x_nhwc.dtype),
        grid_spec=pltpu.PrefetchScalarGridSpec(
            num_scalar_prefetch=0,
            grid=(N, n_h),
            in_specs=[
                pl.BlockSpec((1, TH, WC), center_map),
                pl.BlockSpec((1, 8, WC), top_map),
                pl.BlockSpec((1, 8, WC), bot_map),
                pl.BlockSpec((3, WC, WC), wmap3),    # fetched once (constant idx)
                pl.BlockSpec((1, WC), wmap2),
                pl.BlockSpec((WC, WC), wmap2),
                pl.BlockSpec((1, WC), wmap2),
            ],
            out_specs=pl.BlockSpec((1, TH, WC), center_map),
        ),
        compiler_params=pltpu.CompilerParams(
            dimension_semantics=("parallel", "parallel"),
            vmem_limit_bytes=vmem_limit),
        cost_estimate=cost,
    )(x, x, x, w1_band, b1_m, w2_blk, b2_m)

    return y.reshape(N, H, W, C)


def sa_block_nchw(x_nchw, w1, b1, w2, b2, **kwargs):
    # Public API takes NCHW (PyTorch); NCHW<->NHWC transpose glue stays in XLA.
    x_nhwc = jnp.transpose(x_nchw, (0, 2, 3, 1))
    y_nhwc = sa_block_nhwc(x_nhwc, w1, b1, w2, b2, **kwargs)
    return jnp.transpose(y_nhwc, (0, 3, 1, 2))


# ---------------- deterministic parameter init (synthetic) ----------------
def _orthogonal(key, out_c, fan_in):
    """Mimics torch.nn.init.orthogonal_ on a (out_c, fan_in) flattened weight."""
    a = jax.random.normal(key, (max(out_c, fan_in), min(out_c, fan_in)),
                          jnp.float32)
    q, r = jnp.linalg.qr(a)
    d = jnp.diag(r)
    q = q * jnp.where(d >= 0, 1.0, -1.0)[None, :]
    if out_c < fan_in:
        q = q.T
    return q[:out_c, :fan_in]


def make_params(key, C):
    k1, k2, k3, k4 = jax.random.split(key, 4)
    # conv1: PyTorch weight (out, in, 3, 3) -> flatten (out, in*9), orthogonal
    w1_oikk = _orthogonal(k1, C, C * 9).reshape(C, C, 3, 3)
    w1 = jnp.transpose(w1_oikk, (2, 3, 1, 0))          # (kh, kw, in, out)
    b1 = jax.random.uniform(k2, (C,), jnp.float32, -0.1, 0.1)
    # conv2: (out, in, 1, 1)
    w2_oi = _orthogonal(k3, C, C)
    w2 = w2_oi.T                                        # (in, out)
    b2 = jax.random.uniform(k4, (C,), jnp.float32, -0.1, 0.1)
    return w1, b1, w2, b2


# ---------------- pure-JAX reference for verification ----------------
def reference_nchw(x, w1, b1, w2, b2):
    x_nhwc = jnp.transpose(x, (0, 2, 3, 1))
    c1 = lax.conv_general_dilated(
        x_nhwc, w1, window_strides=(1, 1), padding="SAME",
        dimension_numbers=("NHWC", "HWIO", "NHWC")) + b1
    c1 = jnp.maximum(c1, 0.0)
    att = jax.nn.sigmoid(
        lax.conv_general_dilated(
            c1, w2.reshape(1, 1, *w2.shape), window_strides=(1, 1),
            padding="SAME", dimension_numbers=("NHWC", "HWIO", "NHWC")) + b2)
    y = x_nhwc + att * c1
    return jnp.transpose(y, (0, 3, 1, 2))


if __name__ == "__main__":
    N, C, H, W = 2, 8, 16, 16
    key = jax.random.PRNGKey(0)
    kx, kp = jax.random.split(key)
    x = jax.random.normal(kx, (N, C, H, W), jnp.float32)   # NCHW input
    w1, b1, w2, b2 = make_params(kp, C)

    y_ref = reference_nchw(x, w1, b1, w2, b2)

    # near-f32 semantics: f32 MXU operands, f32 accumulation / elementwise
    y_f32 = jax.block_until_ready(
        sa_block_nchw(x, w1, b1, w2, b2, matmul_dtype=jnp.float32))
    assert y_f32.shape == (N, C, H, W)
    assert jnp.allclose(y_f32, y_ref, atol=2e-2, rtol=2e-2), \
        "f32 kernel mismatch vs reference"

    # default perf path: bf16 MXU operands, f32 accumulation / elementwise
    y_bf16 = jax.block_until_ready(sa_block_nchw(x, w1, b1, w2, b2))
    assert y_bf16.shape == (N, C, H, W)
    assert jnp.allclose(y_bf16, y_ref, atol=7e-2, rtol=7e-2), \
        "bf16 kernel mismatch vs reference"

    print("KERNEL_OK")
</pallas_src>

<mosaic_0001>
module attributes {stable_mosaic.version = 11 : i64} {
  func.func @_sa_kernel(%arg0: i32, %arg1: i32, %arg2: memref<1x16x128xf32, #tpu.memory_space<vmem>>, %arg3: memref<1x8x128xf32, #tpu.memory_space<vmem>>, %arg4: memref<1x8x128xf32, #tpu.memory_space<vmem>>, %arg5: memref<3x128x128xf32, #tpu.memory_space<vmem>>, %arg6: memref<1x128xf32, #tpu.memory_space<vmem>>, %arg7: memref<128x128xf32, #tpu.memory_space<vmem>>, %arg8: memref<1x128xf32, #tpu.memory_space<vmem>>, %arg9: memref<1x16x128xf32, #tpu.memory_space<vmem>>) attributes {dimension_semantics = [#tpu.dimension_semantics<parallel>, #tpu.dimension_semantics<parallel>], iteration_bounds = array<i64: 2, 1>, scalar_prefetch = 0 : i64, scratch_operands = 0 : i64, tpu.core_type = #tpu.core_type<tc>, window_params = [{transform_indices = @transform_0, window_bounds = array<i64: 1, 16, 128>}, {transform_indices = @transform_1, window_bounds = array<i64: 1, 8, 128>}, {transform_indices = @transform_2, window_bounds = array<i64: 1, 8, 128>}, {pipeline_mode = #tpu.pipeline_mode<synchronous>, transform_indices = @transform_3, window_bounds = array<i64: 3, 128, 128>}, {pipeline_mode = #tpu.pipeline_mode<synchronous>, transform_indices = @transform_4, window_bounds = array<i64: 1, 128>}, {pipeline_mode = #tpu.pipeline_mode<synchronous>, transform_indices = @transform_5, window_bounds = array<i64: 128, 128>}, {pipeline_mode = #tpu.pipeline_mode<synchronous>, transform_indices = @transform_6, window_bounds = array<i64: 1, 128>}, {transform_indices = @transform_7, window_bounds = array<i64: 1, 16, 128>}]} {
    %c0 = arith.constant 0 : index
    %c0_0 = arith.constant 0 : index
    %c0_1 = arith.constant 0 : index
    %0 = vector.load %arg2[%c0, %c0_0, %c0_1] : memref<1x16x128xf32, #tpu.memory_space<vmem>>, vector<1x16x128xf32>
    %1 = vector.shape_cast %0 : vector<1x16x128xf32> to vector<16x128xf32>
    %c0_i32 = arith.constant 0 : i32
    %2 = arith.cmpi sgt, %arg1, %c0_i32 : i32
    %c0_2 = arith.constant 0 : index
    %c0_3 = arith.constant 0 : index
    %c0_4 = arith.constant 0 : index
    %3 = vector.load %arg3[%c0_2, %c0_3, %c0_4] : memref<1x8x128xf32, #tpu.memory_space<vmem>>, vector<1x8x128xf32>
    %4 = vector.shape_cast %3 : vector<1x8x128xf32> to vector<8x128xf32>
    %5 = vector.extract_strided_slice %4 {offsets = [7, 0], sizes = [1, 128], strides = [1, 1]} : vector<8x128xf32> to vector<1x128xf32>
    %cst = arith.constant 0.000000e+00 : f32
    %6 = vector.broadcast %cst : f32 to vector<1x128xf32>
    %7 = arith.select %2, %5, %6 : vector<1x128xf32>
    %c0_i32_5 = arith.constant 0 : i32
    %8 = arith.cmpi slt, %arg1, %c0_i32_5 : i32
    %c0_6 = arith.constant 0 : index
    %c0_7 = arith.constant 0 : index
    %c0_8 = arith.constant 0 : index
    %9 = vector.load %arg4[%c0_6, %c0_7, %c0_8] : memref<1x8x128xf32, #tpu.memory_space<vmem>>, vector<1x8x128xf32>
    %10 = vector.shape_cast %9 : vector<1x8x128xf32> to vector<8x128xf32>
    %11 = vector.extract_strided_slice %10 {offsets = [0, 0], sizes = [1, 128], strides = [1, 1]} : vector<8x128xf32> to vector<1x128xf32>
    %cst_9 = arith.constant 0.000000e+00 : f32
    %12 = vector.broadcast %cst_9 : f32 to vector<1x128xf32>
    %13 = arith.select %8, %11, %12 : vector<1x128xf32>
    %14 = vector.extract_strided_slice %1 {offsets = [0, 0], sizes = [15, 128], strides = [1, 1]} : vector<16x128xf32> to vector<15x128xf32>
    %15 = tpu.concatenate %7, %14 in 0 : vector<1x128xf32>, vector<15x128xf32> -> vector<16x128xf32>
    %16 = vector.extract_strided_slice %1 {offsets = [1, 0], sizes = [15, 128], strides = [1, 1]} : vector<16x128xf32> to vector<15x128xf32>
    %17 = tpu.concatenate %16, %13 in 0 : vector<15x128xf32>, vector<1x128xf32> -> vector<16x128xf32>
    %c0_10 = arith.constant 0 : index
    %c0_11 = arith.constant 0 : index
    %c0_12 = arith.constant 0 : index
    %18 = vector.load %arg5[%c0_10, %c0_11, %c0_12] : memref<3x128x128xf32, #tpu.memory_space<vmem>>, vector<1x128x128xf32>
    %19 = vector.shape_cast %18 : vector<1x128x128xf32> to vector<128x128xf32>
    %cst_13 = arith.constant dense<0.000000e+00> : vector<16x128xf32>
    %20 = tpu.matmul %15, %19, %cst_13 {dimension_numbers = #tpu.dot_dimension_numbers<[1], [0], [0], [1], [0, 0, 1, 1], [], []>} : vector<16x128xf32>, vector<128x128xf32>, vector<16x128xf32> -> vector<16x128xf32>
    %c1 = arith.constant 1 : index
    %c0_14 = arith.constant 0 : index
    %c0_15 = arith.constant 0 : index
    %21 = vector.load %arg5[%c1, %c0_14, %c0_15] : memref<3x128x128xf32, #tpu.memory_space<vmem>>, vector<1x128x128xf32>
    %22 = vector.shape_cast %21 : vector<1x128x128xf32> to vector<128x128xf32>
    %cst_16 = arith.constant dense<0.000000e+00> : vector<16x128xf32>
    %23 = tpu.matmul %1, %22, %cst_16 {dimension_numbers = #tpu.dot_dimension_numbers<[1], [0], [0], [1], [0, 0, 1, 1], [], []>} : vector<16x128xf32>, vector<128x128xf32>, vector<16x128xf32> -> vector<16x128xf32>
    %24 = arith.addf %20, %23 : vector<16x128xf32>
    %c2 = arith.constant 2 : index
    %c0_17 = arith.constant 0 : index
    %c0_18 = arith.constant 0 : index
    %25 = vector.load %arg5[%c2, %c0_17, %c0_18] : memref<3x128x128xf32, #tpu.memory_space<vmem>>, vector<1x128x128xf32>
    %26 = vector.shape_cast %25 : vector<1x128x128xf32> to vector<128x128xf32>
    %cst_19 = arith.constant dense<0.000000e+00> : vector<16x128xf32>
    %27 = tpu.matmul %17, %26, %cst_19 {dimension_numbers = #tpu.dot_dimension_numbers<[1], [0], [0], [1], [0, 0, 1, 1], [], []>} : vector<16x128xf32>, vector<128x128xf32>, vector<16x128xf32> -> vector<16x128xf32>
    %28 = arith.addf %24, %27 : vector<16x128xf32>
    %c0_20 = arith.constant 0 : index
    %c0_21 = arith.constant 0 : index
    %29 = vector.load %arg6[%c0_20, %c0_21] : memref<1x128xf32, #tpu.memory_space<vmem>>, vector<1x128xf32>
    %30 = vector.broadcast %29 : vector<1x128xf32> to vector<16x128xf32>
    %31 = arith.addf %28, %30 : vector<16x128xf32>
    %cst_22 = arith.constant 0.000000e+00 : f32
    %32 = vector.broadcast %cst_22 : f32 to vector<16x128xf32>
    %33 = arith.maximumf %31, %32 : vector<16x128xf32>
    %c0_23 = arith.constant 0 : index
    %c0_24 = arith.constant 0 : index
    %34 = vector.load %arg7[%c0_23, %c0_24] : memref<128x128xf32, #tpu.memory_space<vmem>>, vector<128x128xf32>
    %cst_25 = arith.constant dense<0.000000e+00> : vector<16x128xf32>
    %35 = tpu.matmul %33, %34, %cst_25 {dimension_numbers = #tpu.dot_dimension_numbers<[1], [0], [0], [1], [0, 0, 1, 1], [], []>} : vector<16x128xf32>, vector<128x128xf32>, vector<16x128xf32> -> vector<16x128xf32>
    %c0_26 = arith.constant 0 : index
    %c0_27 = arith.constant 0 : index
    %36 = vector.load %arg8[%c0_26, %c0_27] : memref<1x128xf32, #tpu.memory_space<vmem>>, vector<1x128xf32>
    %37 = vector.broadcast %36 : vector<1x128xf32> to vector<16x128xf32>
    %38 = arith.addf %35, %37 : vector<16x128xf32>
    %39 = arith.negf %38 : vector<16x128xf32>
    %40 = math.exp %39 : vector<16x128xf32>
    %cst_28 = arith.constant 1.000000e+00 : f32
    %41 = vector.broadcast %cst_28 : f32 to vector<16x128xf32>
    %42 = arith.addf %41, %40 : vector<16x128xf32>
    %43 = arith.divf %41, %42 : vector<16x128xf32>
    %44 = arith.mulf %43, %33 : vector<16x128xf32>
    %45 = arith.addf %1, %44 : vector<16x128xf32>
    %c0_29 = arith.constant 0 : index
    %c0_30 = arith.constant 0 : index
    %c0_31 = arith.constant 0 : index
    %46 = vector.load %arg9[%c0_29, %c0_30, %c0_31] : memref<1x16x128xf32, #tpu.memory_space<vmem>>, vector<1x16x128xf32>
    %47 = vector.shape_cast %46 : vector<1x16x128xf32> to vector<16x128xf32>
    %48 = vector.shape_cast %45 : vector<16x128xf32> to vector<1x16x128xf32>
    tpu.vector_store %arg9[%c0_29, %c0_30, %c0_31], %48 {strides = array<i32>} : memref<1x16x128xf32, #tpu.memory_space<vmem>>, vector<1x16x128xf32>,
    return
  }
  func.func @transform_0(%arg0: i32, %arg1: i32) -> (i32, i32, i32) {
    %c0_i32 = arith.constant 0 : i32
    %c0_i32_0 = arith.constant 0 : i32
    return %arg0, %arg1, %c0_i32 : i32, i32, i32
  }
  func.func @transform_1(%arg0: i32, %arg1: i32) -> (i32, i32, i32) {
    %c2_i32 = arith.constant 2 : i32
    %0 = arith.muli %arg1, %c2_i32 : i32
    %c1_i32 = arith.constant 1 : i32
    %1 = arith.subi %0, %c1_i32 : i32
    %c0_i32 = arith.constant 0 : i32
    %2 = arith.maxsi %1, %c0_i32 : i32
    %c0_i32_0 = arith.constant 0 : i32
    %c0_i32_1 = arith.constant 0 : i32
    return %arg0, %2, %c0_i32_0 : i32, i32, i32
  }
  func.func @transform_2(%arg0: i32, %arg1: i32) -> (i32, i32, i32) {
    %c1_i32 = arith.constant 1 : i32
    %0 = arith.addi %arg1, %c1_i32 : i32
    %c2_i32 = arith.constant 2 : i32
    %1 = arith.muli %0, %c2_i32 : i32
    %c1_i32_0 = arith.constant 1 : i32
    %2 = arith.minsi %1, %c1_i32_0 : i32
    %c0_i32 = arith.constant 0 : i32
    %c0_i32_1 = arith.constant 0 : i32
    return %arg0, %2, %c0_i32 : i32, i32, i32
  }
  func.func @transform_3(%arg0: i32, %arg1: i32) -> (i32, i32, i32) {
    %c0_i32 = arith.constant 0 : i32
    %c0_i32_0 = arith.constant 0 : i32
    %c0_i32_1 = arith.constant 0 : i32
    %c0_i32_2 = arith.constant 0 : i32
    return %c0_i32, %c0_i32_0, %c0_i32_1 : i32, i32, i32
  }
  func.func @transform_4(%arg0: i32, %arg1: i32) -> (i32, i32) {
    %c0_i32 = arith.constant 0 : i32
    %c0_i32_0 = arith.constant 0 : i32
    %c0_i32_1 = arith.constant 0 : i32
    return %c0_i32, %c0_i32_0 : i32, i32
  }
  func.func @transform_5(%arg0: i32, %arg1: i32) -> (i32, i32) {
    %c0_i32 = arith.constant 0 : i32
    %c0_i32_0 = arith.constant 0 : i32
    %c0_i32_1 = arith.constant 0 : i32
    return %c0_i32, %c0_i32_0 : i32, i32
  }
  func.func @transform_6(%arg0: i32, %arg1: i32) -> (i32, i32) {
    %c0_i32 = arith.constant 0 : i32
    %c0_i32_0 = arith.constant 0 : i32
    %c0_i32_1 = arith.constant 0 : i32
    return %c0_i32, %c0_i32_0 : i32, i32
  }
  func.func @transform_7(%arg0: i32, %arg1: i32) -> (i32, i32, i32) {
    %c0_i32 = arith.constant 0 : i32
    %c0_i32_0 = arith.constant 0 : i32
    return %arg0, %arg1, %c0_i32 : i32, i32, i32
  }
}

</mosaic_0001>

<bundles_post_ra>
// kernel: tpu_custom_call.1
= control target key start
LH: loop header
LB: loop body
LE: loop exit
PB: predicated region body
PF: predicated region fallthrough
CT: control target
= control target key end

     0   :  { %s1976_s0 = inlined_call_operand.hbm [shape: f32[2,16,128], index: 0, kind: input, shape index: {}]   ;;  %s1977_s1 = inlined_call_operand.hbm [shape: f32[2,16,128], index: 1, kind: input, shape index: {}]   ;;  %s1978_s2 = inlined_call_operand.hbm [shape: f32[2,16,128], index: 2, kind: input, shape index: {}]   ;;  %s1979_s3 = inlined_call_operand.hbm [shape: f32[3,128,128], index: 3, kind: input, shape index: {}]   ;;  %s1980_s4 = inlined_call_operand.vmem [shape: f32[1,128], index: 4, kind: input, shape index: {}]   ;;  %s1981_s5 = inlined_call_operand.hbm [shape: f32[128,128], index: 5, kind: input, shape index: {}]   ;;  %s1982_s6 = inlined_call_operand.vmem [shape: f32[1,128], index: 6, kind: input, shape index: {}]   ;;  %s1983_s7 = inlined_call_operand.hbm [shape: f32[2,16,128], index: 7, kind: output, shape index: {}]  }
   0x1   :  { %1998 = sst [smem:[#allocation21_spill]] %s1977_s1 }
   0x2   :  { %1999 = sst [smem:[#allocation22_spill]] %s1978_s2 }
   0x3   :  { %2000 = sst [smem:[#allocation23_spill]] %s1979_s3 }
   0x4   :  { %2001 = sst [smem:[#allocation24_spill]] %s1983_s7 }
   0x5   :  { %12 = vsyncpa [#allocation3], 0 }
   0x6   :  { %14 = vsyncpa [#allocation3 + $0x1], 0 }
   0x7   :  { %15 = vsyncpa [#allocation6], 0 }
   0x8   :  { %17 = vsyncpa [#allocation6 + $0x1], 0 }
   0x9   :  { %18 = vsyncpa [#allocation9], 0 }
   0xa   :  { %19 = vsyncpa [#allocation4], 0 }
   0xb   :  { %21 = vsyncpa [#allocation4 + $0x1], 0  ;;  %s1698_s24 = smov 0   ;;  %s1700_s25 = smov 0  }
   0xc   :  { %s1702_s26 = smov 0   ;;  %s1704_s27 = smov 0  }
   0xd   :  { %s1706_s28 = smov 0   ;;  %s1708_s29 = smov 0  }
   0xe LB: > { %2002 = sst [smem:[#allocation16_spill]] %s1625_s24  ;;  %s1729_s30 = sadd.s32 4294967295, %s1645_s29   ;;  %s1645_s29 = sphi %s1708_s29, %s27_s29   ;;  %s1641_s28 = sphi %s1706_s28, %s2034_s28   ;;  %s1637_s27 = sphi %s1704_s27, %s2033_s27   ;;  %s1633_s26 = sphi %s1702_s26, %s2037_s26   ;;  %s1629_s25 = sphi %s1700_s25, %s2036_s25   ;;  %s1625_s24 = sphi %s1698_s24, %s2035_s24  }
   0xf   : > { %2003 = sst [smem:[#allocation17_spill]] %s1641_s28  ;;  %s1067_s8 = sadd.s32 4294967294, %s1645_s29  }
  0x10   : > { %p61_p0 = scmp.ne.s32.totalorder %s1629_s25, %s1625_s24  ;;  %p1993_p1 = scmp.eq.s32.totalorder %s1729_s30, 0 }
  0x11   : > { %p249_p3 = scmp.eq.s32.totalorder %s1067_s8, 1  ;;  %p1068_p5 = scmp.ge.s32.totalorder %s1645_s29, 1 }
  0x12   : > { %p1738_p4 = por %p1993_p1, %p61_p0  ;;  %p256_p7 = scmp.lt.s32.totalorder %s1645_s29, 3 }
  0x13   : > { %p1743_p6 = por %p249_p3, %p61_p0  ;;  %s1647_s12 = smov [#allocation8]  }
  0x14   : > { %p1748_p8 = pnand %p1068_p5, %p256_p7  ;;  %s268_s13 = sshll.u32 %s1647_s12, 4  ;;  %s269_s13 = int_to_ptr.vmem [resolvable:$true] %s268_s13 }
  0x15   : > { %s2005_s10 = scalar_select %p1743_p6, 1, 0 }
  0x16   : > { %p1331_p9 = pneg %p1748_p8  ;;  %s39_s15 = sadd.s32 1, %s1641_s28 }
  0x17   : > { %2006 = sst [smem:[#allocation18_spill]] %s2005_s10  ;;  %s1432_s16 = scalar_lea.vmem %s269_s13, 6144 }
  0x18   : > { %p1757_p11 = pnand %p1331_p9, %p1993_p1  ;;  %p1433_p13 = scmp.ne.s32.totalorder %s269_s13, %s1432_s16 }
  0x19   : > { %p1440_p5 = scmp.lt.s32.totalorder %s269_s13, %s269_s13  ;;  %p1441_p7 = scmp.lt.s32.totalorder %s1432_s16, %s1432_s16 }
  0x1a   : > { %p1994_p12 = pneg %p1757_p11 }
  0x1b   : > { %p1442_p2 = por %p1441_p7, %p1440_p5 }
  0x1c   : > { %p1435_p0 = pnand %p1433_p13, %p1994_p12 }
  0x1e   : > { %p1436_p3 = pneg %p1435_p0 }
  0x20   : > { %p1443_p10 = pnand %p1442_p2, %p1436_p3 }
  0x22   : > { %1446 = shalt.err (!%p1443_p10)
}
  0x23   : > { %s1984_s17 = smov 128   ;;  %s1986_s18 = smov 8  }
  0x24   : > { %s2009_s3 = sld [smem:[#allocation23_spill]]  ;;  %p41_p2 = scmp.ge.s32.totalorder %s39_s15, 2 }
  0x25   : > { %s48_s21 = sadd.s32 1, %s1633_s26  ;;  %p55_p9 = scmp.ne.s32.totalorder %s1633_s26, %s1629_s25 }
  0x26   : > { %p56_p10 = scmp.eq.s32.totalorder %s1645_s29, 0  ;;  %s2039_s15 = smov (%p41_p2, %s39_s15), 0 }
  0x27   : > { %2010 = sst [smem:[#allocation19_spill]] %s2039_s15  ;;  %p2011_p0 = scmp.eq.s32.totalorder %s1729_s30, 1 }
  0x28   : > { %p57_p13 = por %p56_p10, %p55_p9  ;;  %s43_s23 = ssub.s32 %s1641_s28, %s2039_s15 }
  0x29   : > { %p1783_p3 = por %p2011_p0, %p55_p9  ;;  %p1354_p5 = scmp.lt.s32.totalorder %s1645_s29, 2 }
  0x2a   : > { %1334 = dma.hbm_to_vmem [thread:$0]  (!%p1757_p11), %s2009_s3, 6144, %s269_s13, [#allocation9], %s1984_s17, %s1984_s17, %s1986_s18  }
  0x2b   : > { %s2012_s22 = scalar_select %p1783_p3, 1, 0 }
  0x2c   : > { %p46_p7 = scmp.eq.s32.totalorder %s43_s23, 0  ;;  %s1791_s8 = sand.u32 1, %s1633_s26  }
  0x2d   : > { %s1794_s12 = sshll.u32 %s1641_s28, 8  ;;  %p1796_p2 = pnand %p1354_p5, %p57_p13 }
  0x2e   : > { %s1801_s16 = scalar_select %p46_p7, %s1633_s26, %s48_s21  }
  0x2f   : > { %s324_s17 = sand.u32 1, %s1645_s29   ;;  %s1997_s18 = sshll.u32 %s1791_s8, 3 }
  0x30   : > { %2014 = sst [smem:[#allocation20_spill]] %s1801_s16  ;;  %s328_s10 = scalar_lea.vmem [#allocation5], %s1997_s18 }
  0x31   : > { %s2015_s1 = sld [smem:[#allocation21_spill]]  ;;  %s341_s24 = sshll.u32 %s328_s10, 4  ;;  %s342_s24 = int_to_ptr.vmem [resolvable:$true] %s341_s24 }
  0x32   : > { %s1815_s7 = scalar_lea.sflag [#allocation6], %s324_s17  ;;  %p1995_p9 = pneg %p1796_p2 }
  0x33   : > { %s1460_s21 = scalar_lea.vmem %s342_s24, 128  ;;  %s1650_s19 = smov [#allocation5]  }
  0x34   : > { %p1461_p10 = scmp.ne.s32.totalorder %s342_s24, %s1460_s21  ;;  %s1465_s20 = sshll.u32 %s1650_s19, 4  ;;  %s1466_s20 = int_to_ptr.vmem [resolvable:$false] %s1465_s20 }
  0x35   : > { %s1467_s23 = scalar_lea.vmem %s1466_s20, 256  ;;  %p1468_p5 = scmp.lt.s32.totalorder %s342_s24, %s1466_s20 }
  0x36   : > { %p1463_p13 = pnand %p1461_p10, %p1995_p9  ;;  %p1469_p7 = scmp.lt.s32.totalorder %s1467_s23, %s1460_s21 }
  0x37   : > { %s339_s28 = scalar_lea.hbm %s2015_s1, %s1794_s12 }
  0x38   : > { %p1464_p0 = pneg %p1463_p13  ;;  %p1470_p1 = por %p1469_p7, %p1468_p5 }
  0x3a   : > { %p1471_p12 = pnand %p1470_p1, %p1464_p0 }
  0x3c   : > { %1474 = shalt.err (!%p1471_p12)
}
  0x3d   : > { %1344 = dma.hbm_to_vmem [thread:$0]  (!%p1796_p2), %s339_s28, 128, %s342_s24, %s1815_s7  }
  0x3e   : > { %s1651_s3 = smov [#allocation10]   ;;  %s1072_s15 = sshll.u32 %s1791_s8, 4 }
  0x3f   : > { %s284_s10 = sshll.u32 %s1651_s3, 4  ;;  %p2016_p13 = pneg %p1757_p11  ;;  %s285_s10 = int_to_ptr.vmem [resolvable:$true] %s284_s10 }
  0x40   : > { %s1486_s17 = scalar_lea.vmem %s285_s10, 2048  ;;  %p1494_p3 = scmp.lt.s32.totalorder %s285_s10, %s285_s10 }
  0x41   : > { %p1487_p10 = scmp.ne.s32.totalorder %s285_s10, %s1486_s17  ;;  %p1495_p5 = scmp.lt.s32.totalorder %s1486_s17, %s1486_s17 }
  0x43   : > { %p1489_p9 = pnand %p1487_p10, %p2016_p13  ;;  %p1496_p1 = por %p1495_p5, %p1494_p3 }
  0x45   : > { %p1490_p6 = pneg %p1489_p9 }
  0x47   : > { %p1497_p12 = pnand %p1496_p1, %p1490_p6 }
  0x49   : > { %1500 = shalt.err (!%p1497_p12)
}
  0x4a   : > { %s2017_s23 = smov 8   ;;  %s2018_s21 = smov 128  }
  0x4b   : > { %1337 = dma.hbm_to_vmem [thread:$0]  (!%p1757_p11), %s1981_s5, 2048, %s285_s10, [#allocation9], %s2018_s21, %s2018_s21, %s2017_s23  }
  0x4c   : > { %s305_s19 = scalar_lea.vmem [#allocation2], %s1072_s15  ;;  %s1100_s3 = sadd.s32 128, %s1794_s12 }
  0x4d   : > { %s314_s20 = sshll.u32 %s305_s19, 4  ;;  %s2019_s2 = sld [smem:[#allocation22_spill]]  ;;  %s315_s20 = int_to_ptr.vmem [resolvable:$true] %s314_s20 }
  0x4e   : > { %s302_s14 = scalar_lea.sflag [#allocation3], %s1791_s8  ;;  %s1514_s16 = scalar_lea.vmem %s315_s20, 256 }
  0x4f   : > { %p1515_p6 = scmp.ne.s32.totalorder %s315_s20, %s1514_s16  ;;  %p2020_p3 = pneg %p1796_p2 }
  0x50   : > { %s1652_s24 = smov [#allocation2]  }
  0x51   : > { %p1517_p9 = pnand %p1515_p6, %p2020_p3  ;;  %s1519_s28 = sshll.u32 %s1652_s24, 4  ;;  %s1520_s28 = int_to_ptr.vmem [resolvable:$false] %s1519_s28 }
  0x52   : > { %s1521_s10 = scalar_lea.vmem %s1520_s28, 512  ;;  %p1522_p11 = scmp.lt.s32.totalorder %s315_s20, %s1520_s28 }
  0x53   : > { %s1841_s1 = scalar_lea.hbm %s2019_s2, %s1100_s3  ;;  %p1518_p0 = pneg %p1517_p9 }
  0x54   : > { %p1523_p7 = scmp.lt.s32.totalorder %s1521_s10, %s1514_s16 }
  0x56   : > { %p1524_p10 = por %p1523_p7, %p1522_p11 }
  0x58   : > { %p1525_p13 = pnand %p1524_p10, %p1518_p0 }
  0x5a   : > { %1528 = shalt.err (!%p1525_p13)
}
  0x5b   : > { %s2021_s19 = scalar_lea.hbm %s1976_s0, %s1794_s12  ;;  %s2022_s3 = sshll.u32 %s1791_s8, 3 }
  0x5c   : > { %1341 = dma.hbm_to_vmem [thread:$0]  (!%p1796_p2), %s2021_s19, 256, %s315_s20, %s302_s14, %s2018_s21, %s2018_s21, %s2017_s23  }
  0x5d   : > { %s352_s17 = scalar_lea.vmem [#allocation7], %s2022_s3  ;;  %p2023_p1 = pmov %p2020_p3 }
  0x5e   : > { %s365_s24 = sshll.u32 %s352_s17, 4  ;;  %s1653_s28 = smov [#allocation7]   ;;  %s366_s24 = int_to_ptr.vmem [resolvable:$true] %s365_s24 }
  0x5f   : > { %s1542_s16 = scalar_lea.vmem %s366_s24, 128  ;;  %s1547_s10 = sshll.u32 %s1653_s28, 4  ;;  %s1548_s10 = int_to_ptr.vmem [resolvable:$false] %s1547_s10 }
  0x60   : > { %p1543_p5 = scmp.ne.s32.totalorder %s366_s24, %s1542_s16  ;;  %s1549_s2 = scalar_lea.vmem %s1548_s10, 256 }
  0x61   : > { %p1550_p3 = scmp.lt.s32.totalorder %s366_s24, %s1548_s10  ;;  %p1551_p9 = scmp.lt.s32.totalorder %s1549_s2, %s1542_s16 }
  0x62   : > { %p1545_p12 = pnand %p1543_p5, %p2023_p1 }
  0x63   : > { %p1552_p0 = por %p1551_p9, %p1550_p3 }
  0x64   : > { %p1546_p6 = pneg %p1545_p12 }
  0x66   : > { %p1553_p11 = pnand %p1552_p0, %p1546_p6 }
  0x68   : > { %1556 = shalt.err (!%p1553_p11)
}
  0x69   : > { %1347 = dma.hbm_to_vmem [thread:$0]  (!%p1796_p2), %s1841_s1, 128, %s366_s24, %s1815_s7  }
  0x6a   : > { %374 = sbr.rel (%p1748_p8) target bundleno = 634 (0x27a), region = 48  ;;  %s1869_s8 = sand.u32 (!%p1748_p8), 1, %s1629_s25  }
  0x6b   : > { %s1082_s12 = sshll.u32 (!%p1748_p8), %s1869_s8, 4  ;;  %s377_s2 = scalar_lea.sflag (!%p1748_p8), [#allocation3], %s1869_s8 }
  0x6c   : > { %s1875_s23 = scalar_lea.vmem (!%p1748_p8), [#allocation2], %s1082_s12 }
  0x6f   : > { %1608 = dma.done.wait (%p1738_p4), %s377_s2, 256  }
  0x70   : > { %1610 = vsyncadd (%p1738_p4), %s377_s2, 4294967040  ;;  %s385_s1 = sand.u32 1, %s1729_s30  }
  0x71   : > { %s386_s7 = scalar_lea.sflag [#allocation6], %s385_s1 }
  0x72   : > { %1612 = dma.done.wait (%p1738_p4), %s386_s7, 256  }
  0x73   : > { %1614 = vsyncadd (%p1738_p4), %s386_s7, 4294967040  ;;  %p2024_p8 = scmp.eq.s32.totalorder %s1729_s30, 0 }
  0x75   : > { %1616 = dma.done.wait (%p2024_p8), [#allocation9], 8192   ;;  %p2025_p2 = pmov %p2024_p8 }
  0x76   : > { %v525_v0 = vld [vmem:[#allocation8 + $0xf8] sm:$0xff]  ;;  %v524_v2 = vld [vmem:[#allocation8 + $0xf0] sm:$0xff]  ;;  %v523_v4 = vld [vmem:[#allocation8 + $0xe8] sm:$0xff]  ;;  %v1654_v32 = vmov 0.0   ;;  %vm476_vm0 = vcmask 1040384   ;;  %vm483_vm1 = vcmask 1046528  }
  0x77   : > { %1618 = vsyncadd (%p2025_p2), [#allocation9], 4294959104  ;;  %v508_v1 = vld [vmem:[#allocation8 + $0x78] sm:$0xff]  ;;  %1175 = vmatprep.subr.mxu0 %v525_v0  ;;  %v507_v3 = vld [vmem:[#allocation8 + $0x70] sm:$0xff]  ;;  %v472_v33 = vrot.slane %v1654_v32, 7  ;;  %v490_v57 = vrot.slane %v1654_v32, 1 }
  0x78   : > { %1210 = vmatprep.subr.mxu1 %v508_v1  ;;  %1176 = vmatpush3.msra.mxu0 %v525_v0  ;;  %v506_v5 = vld [vmem:[#allocation8 + $0x68] sm:$0xff]  ;;  %v522_v6 = vld [vmem:[#allocation8 + $0xe0] sm:$0xff]  ;;  %v521_v8 = vld [vmem:[#allocation8 + $0xd8] sm:$0xff]  ;;  %s1101_s21 = sshll.u32 %s1637_s27, 8  ;;  %s446_s20 = scalar_lea.vmem [#allocation11], %s1082_s12 }
  0x79   : > { %1211 = vmatpush3.msra.mxu1 %v508_v1  ;;  %1177 = vmatprep.subr.mxu0 %v524_v2  ;;  %v505_v7 = vld [vmem:[#allocation8 + $0x60] sm:$0xff]  ;;  %v504_v9 = vld [vmem:[#allocation8 + $0x58] sm:$0xff]  ;;  %v520_v10 = vld [vmem:[#allocation8 + $0xd0] sm:$0xff]  ;;  %s913_s14 = sshll.u32 %s446_s20, 4  ;;  %s2026_s19 = sld [smem:[#allocation24_spill]]  ;;  %s1927_s14 = int_to_ptr.vmem [resolvable:$true] %s913_s14 }
  0x7a   : > { %1212 = vmatprep.subr.mxu1 %v507_v3  ;;  %1178 = vmatpush3.msra.mxu0 %v524_v2  ;;  %v503_v11 = vld [vmem:[#allocation8 + $0x50] sm:$0xff]  ;;  %v519_v12 = vld [vmem:[#allocation8 + $0xc8] sm:$0xff]  ;;  %v518_v14 = vld [vmem:[#allocation8 + $0xc0] sm:$0xff]  ;;  %s898_s27 = scalar_lea.sflag [#allocation4], %s1869_s8  ;;  %s1557_s17 = scalar_lea.vmem %s1927_s14, 256 }
  0x7b   : > { %1213 = vmatpush3.msra.mxu1 %v507_v3  ;;  %1179 = vmatprep.subr.mxu0 %v523_v4  ;;  %v502_v13 = vld [vmem:[#allocation8 + $0x48] sm:$0xff]  ;;  %v501_v15 = vld [vmem:[#allocation8 + $0x40] sm:$0xff]  ;;  %v517_v16 = vld [vmem:[#allocation8 + $0xb8] sm:$0xff]  ;;  %p1558_p4 = scmp.ne.s32.totalorder %s1927_s14, %s1557_s17  ;;  %p2027_p7 = scmp.ne.s32.totalorder %s2012_s22, 0 }
  0x7c   : > { %1214 = vmatprep.subr.mxu1 %v506_v5  ;;  %1180 = vmatpush3.msra.mxu0 %v523_v4  ;;  %v500_v17 = vld [vmem:[#allocation8 + $0x38] sm:$0xff]  ;;  %v516_v18 = vld [vmem:[#allocation8 + $0xb0] sm:$0xff]  ;;  %v515_v20 = vld [vmem:[#allocation8 + $0xa8] sm:$0xff]  ;;  %s1655_s24 = smov [#allocation11]  }
  0x7d   : > { %1215 = vmatpush3.msra.mxu1 %v506_v5  ;;  %1181 = vmatprep.subr.mxu0 %v522_v6  ;;  %v499_v19 = vld [vmem:[#allocation8 + $0x30] sm:$0xff]  ;;  %v498_v21 = vld [vmem:[#allocation8 + $0x28] sm:$0xff]  ;;  %v514_v22 = vld [vmem:[#allocation8 + $0xa0] sm:$0xff]  ;;  %p1559_p10 = pnand %p1558_p4, %p2027_p7  ;;  %s1561_s16 = sshll.u32 %s1655_s24, 4  ;;  %s1562_s16 = int_to_ptr.vmem [resolvable:$false] %s1561_s16 }
  0x7e   : > { %1216 = vmatprep.subr.mxu1 %v505_v7  ;;  %1182 = vmatpush3.msra.mxu0 %v522_v6  ;;  %v497_v23 = vld [vmem:[#allocation8 + $0x20] sm:$0xff]  ;;  %v513_v24 = vld [vmem:[#allocation8 + $0x98] sm:$0xff]  ;;  %v512_v27 = vld [vmem:[#allocation8 + $0x90] sm:$0xff]  ;;  %s1563_s28 = scalar_lea.vmem %s1562_s16, 512  ;;  %p1564_p5 = scmp.lt.s32.totalorder %s1927_s14, %s1562_s16 }
  0x7f   : > { %1217 = vmatpush3.msra.mxu1 %v505_v7  ;;  %1183 = vmatprep.subr.mxu0 %v521_v8  ;;  %v496_v25 = vld [vmem:[#allocation8 + $0x18] sm:$0xff]  ;;  %v1891_v26 = vld [vmem:[%s1875_s23] sm:$0xff]  ;;  %v511_v30 = vld [vmem:[#allocation8 + $0x88] sm:$0xff]  ;;  %s1925_s3 = scalar_lea.hbm %s2026_s19, %s1101_s21  ;;  %p1560_p13 = pneg %p1559_p10 }
  0x80   : > { %1218 = vmatprep.subr.mxu1 %v504_v9  ;;  %1184 = vmatpush3.msra.mxu0 %v521_v8  ;;  %v495_v28 = vld [vmem:[#allocation8 + $0x10] sm:$0xff]  ;;  %v1894_v29 = vld [vmem:[%s1875_s23 + $0x8] sm:$0xff]  ;;  %v477_v34 = vrot.slane %v1891_v26, 7  ;;  %v510_v36 = vld [vmem:[#allocation8 + $0x80] sm:$0xff]  ;;  %v484_v38 = vrot.slane %v1891_v26, 1  ;;  %p1565_p1 = scmp.lt.s32.totalorder %s1563_s28, %s1557_s17 }
  0x81   : > { %1219 = vmatpush3.msra.mxu1 %v504_v9  ;;  %1185 = vmatprep.subr.mxu0 %v520_v10  ;;  %v494_v31 = vld [vmem:[#allocation8 + $0x8] sm:$0xff]  ;;  %v478_v35 = vrot.slane %v1894_v29, 7  ;;  %v493_v37 = vld [vmem:[#allocation8] sm:$0xff]  ;;  %v485_v39 = vrot.slane %v1894_v29, 1  ;;  %v692_v42 = vld [vmem:[#allocation8 + $0x178] sm:$0xff] }
  0x82   : > { %1220 = vmatprep.subr.mxu1 %v503_v11  ;;  %1186 = vmatpush3.msra.mxu0 %v520_v10  ;;  %v482_v40 = vsel %vm476_vm0, %v472_v33, %v477_v34  ;;  %v691_v44 = vld [vmem:[#allocation8 + $0x170] sm:$0xff]  ;;  %v690_v45 = vld [vmem:[#allocation8 + $0x168] sm:$0xff]  ;;  %v689_v46 = vld [vmem:[#allocation8 + $0x160] sm:$0xff]  ;;  %p1566_p12 = por %p1565_p1, %p1564_p5 }
  0x83   : > { %1221 = vmatpush3.msra.mxu1 %v503_v11  ;;  %1187 = vmatprep.subr.mxu0 %v519_v12  ;;  %v479_v41 = vsel %vm476_vm0, %v477_v34, %v478_v35  ;;  %v486_v43 = vsel %vm483_vm1, %v484_v38, %v485_v39  ;;  %v688_v47 = vld [vmem:[#allocation8 + $0x158] sm:$0xff]  ;;  %v687_v48 = vld [vmem:[#allocation8 + $0x150] sm:$0xff]  ;;  %v686_v49 = vld [vmem:[#allocation8 + $0x148] sm:$0xff]  ;;  %v492_v60 = vsel %vm483_vm1, %v485_v39, %v490_v57 }
  0x84   : > { %1222 = vmatprep.subr.mxu1 %v502_v13  ;;  %1188 = vmatpush3.msra.mxu0 %v519_v12  ;;  %v685_v50 = vld [vmem:[#allocation8 + $0x140] sm:$0xff]  ;;  %v684_v51 = vld [vmem:[#allocation8 + $0x138] sm:$0xff]  ;;  %v683_v52 = vld [vmem:[#allocation8 + $0x130] sm:$0xff]  ;;  %p1567_p6 = pnand %p1566_p12, %p1560_p13 }
  0x85   : > { %1223 = vmatpush3.msra.mxu1 %v502_v13  ;;  %1189 = vmatprep.subr.mxu0 %v518_v14  ;;  %v682_v53 = vld [vmem:[#allocation8 + $0x128] sm:$0xff]  ;;  %v681_v54 = vld [vmem:[#allocation8 + $0x120] sm:$0xff]  ;;  %v680_v55 = vld [vmem:[#allocation8 + $0x118] sm:$0xff] }
  0x86   : > { %1224 = vmatprep.subr.mxu1 %v501_v15  ;;  %1190 = vmatpush3.msra.mxu0 %v518_v14  ;;  %v679_v56 = vld [vmem:[#allocation8 + $0x110] sm:$0xff]  ;;  %v678_v58 = vld [vmem:[#allocation8 + $0x108] sm:$0xff]  ;;  %v677_v59 = vld [vmem:[#allocation8 + $0x100] sm:$0xff] }
  0x87   : > { %1225 = vmatpush3.msra.mxu1 %v501_v15  ;;  %1191 = vmatprep.subr.mxu0 %v517_v16  ;;  %v796_v61 = vld [vmem:[#allocation10 + $0x78] sm:$0xff]  ;;  %v795_v62 = vld [vmem:[#allocation10 + $0x70] sm:$0xff]  ;;  %v794_v63 = vld [vmem:[#allocation10 + $0x68] sm:$0xff] }
  0x88   : > { %1226 = vmatprep.subr.mxu1 %v500_v17  ;;  %1192 = vmatpush3.msra.mxu0 %v517_v16  ;;  %v793_v0 = vld [vmem:[#allocation10 + $0x60] sm:$0xff]  ;;  %v792_v1 = vld [vmem:[#allocation10 + $0x58] sm:$0xff]  ;;  %v791_v2 = vld [vmem:[#allocation10 + $0x50] sm:$0xff] }
  0x89   : > { %1227 = vmatpush3.msra.mxu1 %v500_v17  ;;  %1193 = vmatprep.subr.mxu0 %v516_v18  ;;  %v790_v3 = vld [vmem:[#allocation10 + $0x48] sm:$0xff]  ;;  %v789_v4 = vld [vmem:[#allocation10 + $0x40] sm:$0xff]  ;;  %v788_v5 = vld [vmem:[#allocation10 + $0x38] sm:$0xff] }
  0x8a   : > { %1228 = vmatprep.subr.mxu1 %v499_v19  ;;  %1194 = vmatpush3.msra.mxu0 %v516_v18  ;;  %v787_v6 = vld [vmem:[#allocation10 + $0x30] sm:$0xff]  ;;  %v786_v7 = vld [vmem:[#allocation10 + $0x28] sm:$0xff]  ;;  %v785_v8 = vld [vmem:[#allocation10 + $0x20] sm:$0xff] }
  0x8b   : > { %1229 = vmatpush3.msra.mxu1 %v499_v19  ;;  %1195 = vmatprep.subr.mxu0 %v515_v20  ;;  %v784_v9 = vld [vmem:[#allocation10 + $0x18] sm:$0xff]  ;;  %v783_v10 = vld [vmem:[#allocation10 + $0x10] sm:$0xff]  ;;  %v782_v11 = vld [vmem:[#allocation10 + $0x8] sm:$0xff] }
  0x8c   : > { %1230 = vmatprep.subr.mxu1 %v498_v21  ;;  %1196 = vmatpush3.msra.mxu0 %v515_v20  ;;  %v781_v12 = vld [vmem:[#allocation10] sm:$0xff] }
  0x8d   : > { %1231 = vmatpush3.msra.mxu1 %v498_v21  ;;  %1197 = vmatprep.subr.mxu0 %v514_v22  ;;  %v1088_v21 = vld [vmem:[%s1980_s4] ss:$0 sm:$0xff] }
  0x8e   : > { %1232 = vmatprep.subr.mxu1 %v497_v23  ;;  %1198 = vmatpush3.msra.mxu0 %v514_v22 }
  0x8f   : > { %1233 = vmatpush3.msra.mxu1 %v497_v23  ;;  %1199 = vmatprep.subr.mxu0 %v513_v24 }
  0x90   : > { %1234 = vmatprep.subr.mxu1 %v496_v25  ;;  %1200 = vmatpush3.msra.mxu0 %v513_v24 }
  0x91   : > { %1235 = vmatpush3.msra.mxu1 %v496_v25  ;;  %1201 = vmatprep.subr.mxu0 %v512_v27 }
  0x92   : > { %1236 = vmatprep.subr.mxu1 %v495_v28  ;;  %1202 = vmatpush3.msra.mxu0 %v512_v27 }
  0x93   : > { %1237 = vmatpush3.msra.mxu1 %v495_v28  ;;  %1203 = vmatprep.subr.mxu0 %v511_v30 }
  0x94   : > { %1238 = vmatprep.subr.mxu1 %v494_v31  ;;  %1204 = vmatpush3.msra.mxu0 %v511_v30  ;;  %v1089_v30 = vld [vmem:[%s1982_s6] ss:$0 sm:$0xff] }
  0x95   : > { %1239 = vmatpush3.msra.mxu1 %v494_v31  ;;  %1205 = vmatprep.subr.mxu0 %v510_v36 }
  0x96   : > { %1240 = vmatprep.subr.mxu1 %v493_v37  ;;  %1206 = vmatpush3.msra.mxu0 %v510_v36 }
  0x97   : > { %1207 = vmatprep.mubr.f32.mxu0 %v1891_v26  ;;  %1241 = vmatpush3.msra.mxu1 %v493_v37 }
  0x98   : > { %1242 = vmatprep.mubr.f32.mxu1 %v482_v40  ;;  %1208 = vmatmul.mubr.f32.vlgmr.msra.gmra.mxu0 %v1894_v29 }
  0x99   : > { %1243 = vmatmul.mubr.f32.vlgmr.msra.gmra.mxu1 %v479_v41  ;;  %1245 = vmatprep.subr.mxu0 %v692_v42 }
  0x9a   : > { %1277 = vmatprep.mubr.f32.mxu0 %v486_v43  ;;  %1246 = vmatpush3.msra.mxu0 %v692_v42 }
  0x9b   : > { %1247 = vmatprep.subr.mxu0 %v691_v44  ;;  %1280 = vmatprep.subr.mxu1 %v796_v61 }
  0x9c   : > { %1248 = vmatpush3.msra.mxu0 %v691_v44  ;;  %1281 = vmatpush3.msra.mxu1 %v796_v61 }
  0x9d   : > { %1249 = vmatprep.subr.mxu0 %v690_v45  ;;  %1282 = vmatprep.subr.mxu1 %v795_v62 }
  0x9e   : > { %1250 = vmatpush3.msra.mxu0 %v690_v45  ;;  %1283 = vmatpush3.msra.mxu1 %v795_v62 }
  0x9f   : > { %1251 = vmatprep.subr.mxu0 %v689_v46  ;;  %1284 = vmatprep.subr.mxu1 %v794_v63 }
  0xa0   : > { %1252 = vmatpush3.msra.mxu0 %v689_v46  ;;  %1285 = vmatpush3.msra.mxu1 %v794_v63 }
  0xa1   : > { %1253 = vmatprep.subr.mxu0 %v688_v47  ;;  %1286 = vmatprep.subr.mxu1 %v793_v0 }
  0xa2   : > { %1254 = vmatpush3.msra.mxu0 %v688_v47  ;;  %1287 = vmatpush3.msra.mxu1 %v793_v0 }
  0xa3   : > { %1255 = vmatprep.subr.mxu0 %v687_v48  ;;  %1288 = vmatprep.subr.mxu1 %v792_v1 }
  0xa4   : > { %1256 = vmatpush3.msra.mxu0 %v687_v48  ;;  %1289 = vmatpush3.msra.mxu1 %v792_v1 }
  0xa5   : > { %1257 = vmatprep.subr.mxu0 %v686_v49  ;;  %1290 = vmatprep.subr.mxu1 %v791_v2 }
  0xa6   : > { %1258 = vmatpush3.msra.mxu0 %v686_v49  ;;  %1291 = vmatpush3.msra.mxu1 %v791_v2 }
  0xa7   : > { %1259 = vmatprep.subr.mxu0 %v685_v50  ;;  %1292 = vmatprep.subr.mxu1 %v790_v3 }
  0xa8   : > { %1260 = vmatpush3.msra.mxu0 %v685_v50  ;;  %1293 = vmatpush3.msra.mxu1 %v790_v3 }
  0xa9   : > { %1261 = vmatprep.subr.mxu0 %v684_v51  ;;  %1294 = vmatprep.subr.mxu1 %v789_v4 }
  0xaa   : > { %1262 = vmatpush3.msra.mxu0 %v684_v51  ;;  %1295 = vmatpush3.msra.mxu1 %v789_v4 }
  0xab   : > { %1263 = vmatprep.subr.mxu0 %v683_v52  ;;  %1296 = vmatprep.subr.mxu1 %v788_v5 }
  0xac   : > { %1264 = vmatpush3.msra.mxu0 %v683_v52  ;;  %1297 = vmatpush3.msra.mxu1 %v788_v5 }
  0xad   : > { %1265 = vmatprep.subr.mxu0 %v682_v53  ;;  %1298 = vmatprep.subr.mxu1 %v787_v6 }
  0xae   : > { %1266 = vmatpush3.msra.mxu0 %v682_v53  ;;  %1299 = vmatpush3.msra.mxu1 %v787_v6 }
  0xaf   : > { %1267 = vmatprep.subr.mxu0 %v681_v54  ;;  %1300 = vmatprep.subr.mxu1 %v786_v7 }
  0xb0   : > { %1268 = vmatpush3.msra.mxu0 %v681_v54  ;;  %1301 = vmatpush3.msra.mxu1 %v786_v7 }
  0xb1   : > { %1269 = vmatprep.subr.mxu0 %v680_v55  ;;  %1302 = vmatprep.subr.mxu1 %v785_v8 }
  0xb2   : > { %1270 = vmatpush3.msra.mxu0 %v680_v55  ;;  %1303 = vmatpush3.msra.mxu1 %v785_v8 }
  0xb3   : > { %1271 = vmatprep.subr.mxu0 %v679_v56  ;;  %1304 = vmatprep.subr.mxu1 %v784_v9 }
  0xb4   : > { %1272 = vmatpush3.msra.mxu0 %v679_v56  ;;  %1305 = vmatpush3.msra.mxu1 %v784_v9 }
  0xb5   : > { %1273 = vmatprep.subr.mxu0 %v678_v58  ;;  %1306 = vmatprep.subr.mxu1 %v783_v10 }
  0xb6   : > { %1274 = vmatpush3.msra.mxu0 %v678_v58  ;;  %1307 = vmatpush3.msra.mxu1 %v783_v10 }
  0xb7   : > { %1275 = vmatprep.subr.mxu0 %v677_v59  ;;  %1308 = vmatprep.subr.mxu1 %v782_v11 }
  0xb8   : > { %1276 = vmatpush3.msra.mxu0 %v677_v59  ;;  %1309 = vmatpush3.msra.mxu1 %v782_v11 }
  0xb9   : > { %1278 = vmatmul.mubr.f32.vlgmr.msra.gmra.mxu0 %v492_v60  ;;  %1310 = vmatprep.subr.mxu1 %v781_v12 }
  0xba   : > { %1311 = vmatpush3.msra.mxu1 %v781_v12 }
 0x158   : > { %v1209_v13 = vpop.f32.mrf.mxu0 }
 0x159   : > { %v1244_v14 = vpop.f32.mrf.mxu1 }
 0x15a   : > { %v592_v15 = vpop.f32.mrf.mxu0  ;;  %v673_v17 = vadd.f32 %v1244_v14, %v1209_v13 }
 0x15b   : > { %v667_v16 = vpop.f32.mrf.mxu1 }
 0x15c   : > { %v668_v19 = vadd.f32 %v667_v16, %v592_v15 }
 0x179   : > { %v1279_v18 = vpop.f32.mrf.mxu0 }
 0x17a   : > { %v769_v20 = vadd.f32 %v1279_v18, %v673_v17 }
 0x17b   : > { %v759_v22 = vpop.f32.mrf.mxu0 }
 0x17c   : > { %v768_v23 = vadd.f32 %v759_v22, %v668_v19  ;;  %v778_v24 = vadd.f32 %v1088_v21, %v769_v20 }
 0x17e   : > { %v777_v25 = vadd.f32 %v1088_v21, %v768_v23  ;;  %v780_v28 = vmax.f32 %v778_v24, 0.0 }
 0x180   : > { %v779_v27 = vmax.f32 %v777_v25, 0.0 }
 0x182   : > { %1312 = vmatprep.mubr.f32.mxu1 %v779_v27 }
 0x183   : > { %1313 = vmatmul.mubr.f32.vlgmr.msra.gmra.mxu1 %v780_v28 }
 0x243   : > { %v1314_v31 = vpop.f32.mrf.mxu1 }
 0x244   : > { %v876_v32 = vadd.f32 %v1314_v31, %v1089_v30 }
 0x245   : > { %v870_v33 = vpop.f32.mrf.mxu1 }
 0x246   : > { %v1091_v34 = vmul.f32 -1.442695, %v876_v32  ;;  %v871_v35 = vadd.f32 %v1089_v30, %v870_v33 }
 0x248   : > { %1413 = vpow2.f32 %v1091_v34  ;;  %v1090_v36 = vmul.f32 -1.442695, %v871_v35 }
 0x24a   : > { %1415 = vpow2.f32 %v1090_v36 }
 0x255   : > { %v1414_v37 = vpop.eup %1413 }
 0x256   : > { %v886_v38 = vadd.f32 1.0, %v1414_v37 }
 0x257   : > { %v1416_v39 = vpop.eup %1415 }
 0x258   : > { %1417 = vrcp.f32 %v886_v38  ;;  %v885_v40 = vadd.f32 1.0, %v1416_v39 }
 0x25a   : > { %1419 = vrcp.f32 %v885_v40 }
 0x265   : > { %v1418_v41 = vpop.eup %1417 }
 0x266   : > { %v892_v42 = vmul.f32 %v1418_v41, %v780_v28 }
 0x267   : > { %v1420_v43 = vpop.eup %1419 }
 0x268   : > { %v891_v44 = vmul.f32 %v1420_v43, %v779_v27  ;;  %v894_v45 = vadd.f32 %v892_v42, %v1894_v29 }
 0x26a   : > { %v893_v46 = vadd.f32 %v891_v44, %v1891_v26  ;;  %896 = vst [vmem:[%s446_s20 + $0x8] sm:$0xff] %v894_v45 }
 0x26c   : > { %895 = vst [vmem:[%s446_s20] sm:$0xff] %v893_v46 }
 0x26d   : > { %1570 = shalt.err (!%p1567_p6)
}
 0x26e   : > { %s1571_s10 = scalar_lea.hbm %s1925_s3, 256  ;;  %s1575_s23 = scalar_lea.hbm %s2026_s19, 512 }
 0x26f   : > { %p1572_p3 = scmp.ne.s32.totalorder %s1925_s3, %s1571_s10  ;;  %p1576_p11 = scmp.lt.s32.totalorder %s1925_s3, %s2026_s19 }
 0x270   : > { %p1577_p8 = scmp.lt.s32.totalorder %s1575_s23, %s1571_s10 }
 0x271   : > { %p1573_p9 = pnand %p1572_p3, %p2027_p7 }
 0x272   : > { %p1578_p2 = por %p1577_p8, %p1576_p11 }
 0x273   : > { %p1574_p0 = pneg %p1573_p9 }
 0x275   : > { %p1579_p4 = pnand %p1578_p2, %p1574_p0 }
 0x277   : > { %1582 = shalt.err (!%p1579_p4)
}
 0x278   : > { %s1656_s30 = smov 128   ;;  %s1657_s9 = smov 8  }
 0x279   : > { %1329 = dma.vmem_to_hbm [thread:$0]  (%p2027_p7), %s1927_s14, 256, %s1925_s3, %s898_s27, %s1656_s30, %s1656_s30, %s1657_s9  }
 0x27a PF: > { %s2028_s11 = sld [smem:[#allocation16_spill]]  ;;  %p2031_p13 = scmp.ge.s32.totalorder %s1645_s29, 2 }
 0x27b   : > { %s2029_s13 = sld [smem:[#allocation18_spill]] }
 0x280   : > { %s928_s21 = sand.u32 1, %s2028_s11  }
 0x281   : > { %p2030_p10 = scmp.ne.s32.totalorder %s2029_s13, 0  ;;  %s929_s20 = scalar_lea.sflag [#allocation4], %s928_s21 }
 0x283   : > { %p1349_p5 = pnand %p2031_p13, %p2030_p10 }
 0x285   : > { %p1350_p1 = pneg %p1349_p5 }
 0x287   : > { %1620 = dma.done.wait (%p1350_p1), %s929_s20, 256  }
 0x288   : > { %1622 = vsyncadd (%p1350_p1), %s929_s20, 4294967040  ;;  %s27_s29 = sadd.s32 1, %s1645_s29   ;;  %s2032_s22 = sld [smem:[#allocation20_spill]] }
 0x289   : > { %p24_p12 = scmp.ge.s32.totalorder %s27_s29, 4   ;;  %s2033_s27 = sld [smem:[#allocation17_spill]] }
 0x28a   : > { %s2034_s28 = sld [smem:[#allocation19_spill]]  ;;  %s2035_s24 = smov %s1629_s25 }
 0x28b   : > { %s2036_s25 = smov %s1633_s26  ;;  %26 = sbr.rel (!%p24_p12) target bundleno = 14 (0xe), region = 127 }
 0x28e   : > { %s2037_s26 = smov %s2032_s22 }
 0x290   :  { %934 = vsyncpa [#allocation3], 1 }
 0x291   :  { %936 = vsyncpa [#allocation3 + $0x1], 1 }
 0x292   :  { %937 = vsyncpa [#allocation6], 1 }
 0x293   :  { %939 = vsyncpa [#allocation6 + $0x1], 1 }
 0x294   :  { %940 = vsyncpa [#allocation9], 1 }
 0x295   :  { %941 = vsyncpa [#allocation4], 1 }
 0x296   :  { %943 = vsyncpa [#allocation4 + $0x1], 1 }

</bundles_post_ra>
